<compile_context>
chip_gen: v7x
topology: tpu7x:2x2x1
jax: 0.10.0
libtpu: 0.0.40
codegen_flags: <defaults>
</compile_context>

<pallas_src>
import functools
import math

import jax
import jax.numpy as jnp
from jax.experimental import pallas as pl
from jax.experimental.pallas import tpu as pltpu

_LANE = 128


def _round_up(x, m):
    return ((x + m - 1) // m) * m


def _sublane_align(itemsize):
    # Sublane tile: 8 rows for 32-bit, 16 for 16-bit, 32 for 8-bit dtypes.
    return 8 * max(1, 4 // int(itemsize))


def _slab_bytes(rows, lanes, itemsize):
    """Real VMEM bytes of one (rows, lanes) slab after sublane/lane padding."""
    return (_round_up(max(rows, 1), _sublane_align(itemsize))
            * _round_up(max(lanes, 1), _LANE) * int(itemsize))


def _vmem_capacity_bytes():
    try:
        info = pltpu.get_tpu_info()
        cap = getattr(info, "vmem_capacity_bytes", None)
        if cap:
            return int(cap)
    except Exception:
        pass
    return 64 * 1024 * 1024  # conservative default: v7x per-TensorCore VMEM


def _mse_partial_kernel(in_ref, tgt_ref, out_ref):
    x = in_ref[...].astype(jnp.float32)
    t = tgt_ref[...].astype(jnp.float32)
    d = x - t
    # Reduce everything except the lane (last) axis: bulk of the work is VPU
    # vreg adds plus one cross-sublane reduce.  The tiny cross-lane sum and
    # the mean normalization are deferred to the wrapper.
    partial = jnp.sum(d * d, axis=tuple(range(d.ndim - 1)))
    out_ref[...] = partial.reshape(out_ref.shape)


@functools.partial(jax.jit, static_argnames=("squeeze_channel",))
def skip_last_target_channel_mse(inp, target, squeeze_channel=False):
    """Equivalent of SkipLastTargetChannelWrapper(MSELoss())(input, target).

    inp:    (N, C, *spatial)
    target: (N, C+1, *spatial)  -- last channel dropped before the loss.
    Returns a scalar float32 (mean over all input elements).
    """
    assert target.shape[1] > 1, (
        "Target tensor has a singleton channel dimension, cannot remove channel"
    )

    if squeeze_channel:
        # After dropping the last channel the target is squeezed on dim=1, so
        # the wrapped loss sees input of shape (N, *spatial).  The elementwise
        # MSE is identical if we lift input back to (N, 1, *spatial).
        assert target.shape[1] - 1 == 1
        assert inp.ndim == target.ndim - 1
        inp = inp[:, None, ...]

    N, C = inp.shape[0], inp.shape[1]
    spatial = tuple(inp.shape[2:])
    assert target.shape == (N, C + 1) + spatial

    S = int(math.prod(spatial)) if spatial else 1

    # Lane-dense layout when possible: (..., S//128, 128).  Otherwise a
    # full-extent trailing slab (always a legal block; lanes masked).
    if S % _LANE == 0:
        R, L = S // _LANE, _LANE
    else:
        R, L = 1, S

    in_isz = jnp.dtype(inp.dtype).itemsize
    tg_isz = jnp.dtype(target.dtype).itemsize

    vmem_cap = _vmem_capacity_bytes()
    # Budget for one (input block + target block) pair.  2 pipeline buffers x
    # this pair + output buffers + slack must stay well under the chip's VMEM
    # (~8 MiB per input block on 64+ MiB chips, never below 2 MiB combined).
    pair_budget = min(16 << 20,
                      max(2 << 20, (int(0.7 * vmem_cap) - (8 << 20)) // 2))

    rb_align = max(_sublane_align(in_isz), _sublane_align(tg_isz))
    total_rows = C * R

    if total_rows % rb_align == 0:
        # --- Folded, sublane-dense layout: (N, C*R, L) ---------------------
        # Channel c occupies rows [c*R, (c+1)*R); row blocks only ever cover
        # rows [0, C*R), so the target's extra channel (rows [C*R, (C+1)*R))
        # is never read -- `[:, :-1]` is expressed purely in the BlockSpec.
        x_arr = inp.reshape(N, total_rows, L)
        t_arr = target.reshape(N, (C + 1) * R, L)

        def pair_bytes(rows):
            return (_slab_bytes(rows, L, in_isz)
                    + _slab_bytes(rows, L, tg_isz))

        divs = [d for d in range(total_rows, rb_align - 1, -1)
                if total_rows % d == 0 and d % rb_align == 0]
        rb = next((d for d in divs if pair_bytes(d) <= pair_budget), divs[-1])
        # v7x megacore: keep >= 2 parallel grid steps when we can.
        if N * (total_rows // rb) < 2:
            smaller = [d for d in divs
                       if d < total_rows and pair_bytes(d) <= pair_budget]
            if smaller:
                rb = smaller[0]
        n_b = total_rows // rb

        grid = (N, n_b)
        idx = lambda n, b: (n, b, 0)
        in_specs = [pl.BlockSpec((1, rb, L), idx),
                    pl.BlockSpec((1, rb, L), idx)]
        out_specs = pl.BlockSpec((1, 1, L), idx)
        out_shape = jax.ShapeDtypeStruct((N, n_b, L), jnp.float32)
        pair_block = pair_bytes(rb)
    else:
        # --- Fallback for row counts that can't be sublane-aligned ---------
        # Channels stay on their own (unconstrained) block axis; the spatial
        # slab (R, L) uses full extents so the block is always legal.  Real
        # (padded) slab sizes are used in the budget, so the sublane padding
        # cannot silently blow past the scoped-VMEM limit.
        # TODO(synk): also chunk the R axis into the grid for very large
        # single-channel volumes with awkward row counts, instead of relying
        # on a raised vmem_limit.
        x_arr = inp.reshape(N, C, R, L)
        t_arr = target.reshape(N, C + 1, R, L)

        def pair_bytes(cb):
            return cb * (_slab_bytes(R, L, in_isz)
                         + _slab_bytes(R, L, tg_isz))

        divs = [d for d in range(C, 0, -1) if C % d == 0]
        c_blk = next((d for d in divs if pair_bytes(d) <= pair_budget), 1)
        if N * (C // c_blk) < 2:
            smaller = [d for d in divs
                       if d < C and pair_bytes(d) <= pair_budget]
            if smaller:
                c_blk = smaller[0]
        n_b = C // c_blk

        grid = (N, n_b)
        idx = lambda n, c: (n, c, 0, 0)
        in_specs = [pl.BlockSpec((1, c_blk, R, L), idx),
                    pl.BlockSpec((1, c_blk, R, L), idx)]
        out_specs = pl.BlockSpec((1, 1, 1, L), idx)
        out_shape = jax.ShapeDtypeStruct((N, n_b, 1, L), jnp.float32)
        pair_block = pair_bytes(c_blk)

    # Scoped-VMEM limit reflecting what Mosaic actually allocates:
    # 2 pipeline buffers per operand pair + output buffers + slack.
    out_block = _slab_bytes(1, L, 4)
    vmem_limit = 2 * pair_block + 2 * out_block + (6 << 20)
    vmem_limit = max(16 << 20, vmem_limit)
    vmem_limit = min(vmem_limit, int(0.92 * vmem_cap))

    cost = pl.CostEstimate(
        flops=3 * N * C * S,
        transcendentals=0,
        bytes_accessed=N * C * S * (in_isz + tg_isz) + N * n_b * L * 4,
    )

    partials = pl.pallas_call(
        _mse_partial_kernel,
        out_shape=out_shape,
        grid_spec=pltpu.PrefetchScalarGridSpec(
            num_scalar_prefetch=0,
            grid=grid,
            in_specs=in_specs,
            out_specs=out_specs,
        ),
        compiler_params=pltpu.CompilerParams(
            dimension_semantics=("parallel", "parallel"),
            vmem_limit_bytes=int(vmem_limit),
        ),
        cost_estimate=cost,
    )(x_arr, t_arr)

    # 'mean' reduction of MSELoss over all input elements.
    total = jnp.float32(N * C * S)
    return (jnp.sum(partials) / total).astype(jnp.float32)


def _reference(inp, target, squeeze_channel=False):
    t = target[:, :-1, ...]
    if squeeze_channel:
        t = jnp.squeeze(t, axis=1)
    return jnp.mean((inp.astype(jnp.float32) - t.astype(jnp.float32)) ** 2)


if __name__ == "__main__":
    key = jax.random.PRNGKey(0)
    k1, k2, k3, k4, k5, k6 = jax.random.split(key, 6)

    # Main case: NCHW input, target with one extra channel to skip (f32).
    N, C, H, W = 2, 4, 16, 16
    x = jax.random.normal(k1, (N, C, H, W), dtype=jnp.float32)
    tgt = jax.random.normal(k2, (N, C + 1, H, W), dtype=jnp.float32)
    out = jax.block_until_ready(skip_last_target_channel_mse(x, tgt))
    ref = _reference(x, tgt)
    assert jnp.allclose(out, ref, rtol=1e-5, atol=1e-5), (out, ref)

    # squeeze_channel=True case: input (N, H, W), target (N, 2, H, W).
    xs = jax.random.normal(k3, (N, H, W), dtype=jnp.float32)
    ts = jax.random.normal(k4, (N, 2, H, W), dtype=jnp.float32)
    outs = jax.block_until_ready(
        skip_last_target_channel_mse(xs, ts, squeeze_channel=True))
    refs = _reference(xs, ts, squeeze_channel=True)
    assert jnp.allclose(outs, refs, rtol=1e-5, atol=1e-5), (outs, refs)

    # Mixed-dtype case: bf16 prediction vs f32 target (uses fallback layout).
    xb = jax.random.normal(k5, (N, C, H, W), dtype=jnp.bfloat16)
    tb = jax.random.normal(k6, (N, C + 1, H, W), dtype=jnp.float32)
    outb = jax.block_until_ready(skip_last_target_channel_mse(xb, tb))
    refb = _reference(xb, tb)
    assert jnp.allclose(outb, refb, rtol=1e-4, atol=1e-4), (outb, refb)

    print("KERNEL_OK")
</pallas_src>

<mosaic_0001>
module attributes {stable_mosaic.version = 11 : i64} {
  func.func @_mse_partial_kernel(%arg0: i32, %arg1: i32, %arg2: memref<1x8x128xf32, #tpu.memory_space<vmem>>, %arg3: memref<1x8x128xf32, #tpu.memory_space<vmem>>, %arg4: memref<1x1x128xf32, #tpu.memory_space<vmem>>) attributes {dimension_semantics = [#tpu.dimension_semantics<parallel>, #tpu.dimension_semantics<parallel>], iteration_bounds = array<i64: 2, 1>, scalar_prefetch = 0 : i64, scratch_operands = 0 : i64, tpu.core_type = #tpu.core_type<tc>, window_params = [{transform_indices = @transform_0, window_bounds = array<i64: 1, 8, 128>}, {transform_indices = @transform_1, window_bounds = array<i64: 1, 8, 128>}, {transform_indices = @transform_2, window_bounds = array<i64: 1, 1, 128>}]} {
    %c0 = arith.constant 0 : index
    %c0_0 = arith.constant 0 : index
    %c0_1 = arith.constant 0 : index
    %0 = vector.load %arg2[%c0, %c0_0, %c0_1] : memref<1x8x128xf32, #tpu.memory_space<vmem>>, vector<1x8x128xf32>
    %c0_2 = arith.constant 0 : index
    %c0_3 = arith.constant 0 : index
    %c0_4 = arith.constant 0 : index
    %1 = vector.load %arg3[%c0_2, %c0_3, %c0_4] : memref<1x8x128xf32, #tpu.memory_space<vmem>>, vector<1x8x128xf32>
    %2 = arith.subf %0, %1 : vector<1x8x128xf32>
    %3 = arith.mulf %2, %2 : vector<1x8x128xf32>
    %cst = arith.constant dense<0.000000e+00> : vector<128xf32>
    %4 = vector.multi_reduction <add>, %3, %cst [0, 1] : vector<1x8x128xf32> to vector<128xf32>
    %5 = vector.shape_cast %4 : vector<128xf32> to vector<1x1x128xf32>
    %c0_5 = arith.constant 0 : index
    %c0_6 = arith.constant 0 : index
    %c0_7 = arith.constant 0 : index
    %6 = vector.load %arg4[%c0_5, %c0_6, %c0_7] : memref<1x1x128xf32, #tpu.memory_space<vmem>>, vector<1x1x128xf32>
    tpu.vector_store %arg4[%c0_5, %c0_6, %c0_7], %5 {strides = array<i32>} : memref<1x1x128xf32, #tpu.memory_space<vmem>>, vector<1x1x128xf32>,
    return
  }
  func.func @transform_0(%arg0: i32, %arg1: i32) -> (i32, i32, i32) {
    %c0_i32 = arith.constant 0 : i32
    %c0_i32_0 = arith.constant 0 : i32
    return %arg0, %arg1, %c0_i32 : i32, i32, i32
  }
  func.func @transform_1(%arg0: i32, %arg1: i32) -> (i32, i32, i32) {
    %c0_i32 = arith.constant 0 : i32
    %c0_i32_0 = arith.constant 0 : i32
    return %arg0, %arg1, %c0_i32 : i32, i32, i32
  }
  func.func @transform_2(%arg0: i32, %arg1: i32) -> (i32, i32, i32) {
    %c0_i32 = arith.constant 0 : i32
    %c0_i32_0 = arith.constant 0 : i32
    return %arg0, %arg1, %c0_i32 : i32, i32, i32
  }
}

</mosaic_0001>

<bundles_post_ra>
// kernel: skip_last_target_channel_mse.1
= control target key start
LH: loop header
LB: loop body
LE: loop exit
PB: predicated region body
PF: predicated region fallthrough
CT: control target
= control target key end

     0   :  { %s370_s9 = smov 0   ;;  %s372_s10 = smov 0   ;;  %s403_s0 = inlined_call_operand.vmem [shape: f32[2,8,128], index: 0, kind: input, shape index: {}]   ;;  %s404_s1 = inlined_call_operand.vmem [shape: f32[2,10,128], index: 1, kind: input, shape index: {}]   ;;  %s405_s2 = inlined_call_operand.vmem [shape: f32[2,1,128], index: 2, kind: output, shape index: {}]  }
   0x1   :  { %s374_s11 = smov 0  }
   0x2 LB: > { %s24_s12 = sadd.s32 1, %s349_s10  ;;  %p300_p0 = scmp.ge.s32.totalorder %s353_s11, 1  ;;  %s353_s11 = sphi %s374_s11, %s12_s11   ;;  %s349_s10 = sphi %s372_s10, %s407_s10   ;;  %s345_s9 = sphi %s370_s9, %s406_s9  }
   0x3   : > { %p26_p1 = scmp.ge.s32.totalorder %s24_s12, 2  ;;  %p145_p2 = scmp.lt.s32.totalorder %s353_s11, 3 }
   0x5   : > { %s409_s12 = smov (%p26_p1, %s24_s12), 0  ;;  %p146_p3 = pnand %p300_p0, %p145_p2 }
   0x6   : > { %p178_p4 = scmp.lt.s32.totalorder (!%p146_p3), %s345_s9, 1 }
   0x7   : > { %149 = sbr.rel (%p146_p3) target bundleno = 36 (0x24), region = 28 }
   0xe   : > { %s411_s9 = smov (!%p178_p4, %s345_s9), 1 }
   0xf   : > { %s301_s13 = sshll.u32 %s411_s9, 3  ;;  %s306_s14 = sshll.u32 %s411_s9, 4 }
  0x10   : > { %s184_s17 = scalar_lea.vmem %s403_s0, %s301_s13  ;;  %s192_s20 = scalar_lea.vmem %s404_s1, %s306_s14 }
  0x11   : > { %v199_v0 = vld [vmem:[%s184_s17] sm:$0xff]  ;;  %s198_s23 = scalar_lea.vmem %s405_s2, %s411_s9 }
  0x12   : > { %v200_v1 = vld [vmem:[%s192_s20] sm:$0xff] }
  0x13   : > { %v201_v2 = vsub.f32 %v199_v0, %v200_v1 }
  0x15   : > { %v202_v3 = vmul.f32 %v201_v2, %v201_v2 }
  0x17   : > { %v203_v4 = vrot.slane %v202_v3, 4 }
  0x19   : > { %v204_v5 = vadd.f32 %v203_v4, %v202_v3 }
  0x1b   : > { %v205_v6 = vrot.slane %v204_v5, 2 }
  0x1d   : > { %v206_v7 = vadd.f32 %v205_v6, %v204_v5 }
  0x1f   : > { %v207_v8 = vrot.slane %v206_v7, 1 }
  0x21   : > { %v208_v9 = vadd.f32 %v207_v8, %v206_v7 }
  0x23   : > { %209 = vst [vmem:[%s198_s23] sm:$0x1] %v208_v9 }
  0x24 PF: > { %s12_s11 = sadd.s32 1, %s353_s11   ;;  %s406_s9 = smov %s349_s10 }
  0x25   : > { %p9_p5 = scmp.ge.s32.totalorder %s12_s11, 4   ;;  %s407_s10 = smov %s409_s12 }
  0x27   :  { %11 = sbr.rel (!%p9_p5) target bundleno = 2 (0x2), region = 61 }

</bundles_post_ra>
